<compile_context>
chip_gen: v7x
topology: tpu7x:2x2x1
jax: 0.10.0
libtpu: 0.0.40
codegen_flags: <defaults>
</compile_context>

<pallas_src>
import functools
import math

import numpy as np

import jax
import jax.numpy as jnp
from jax.experimental import pallas as pl
from jax.experimental.pallas import tpu as pltpu

_INV_SQRT2 = 0.7071067811865476


def _erf(x):
    # Abramowitz & Stegun 7.1.26 (5-term) erf approximation, |err| <= 1.5e-7.
    a = jnp.abs(x)
    t = 1.0 / (1.0 + 0.3275911 * a)
    poly = t * (0.254829592 + t * (-0.284496736 + t * (1.421413741
           + t * (-1.453152027 + t * 1.061405429))))
    y = 1.0 - poly * jnp.exp(-a * a)
    return jnp.where(x >= 0, y, -y)


def _gelu_exact(x):
    return 0.5 * x * (1.0 + _erf(x * _INV_SQRT2))


def _ffn_kernel(x_ref, w1_ref, c1_ref, wm_ref, cm_ref, mask_ref,
                w2_ref, c2_ref, o_ref, *, W):
    """One batch element. Activations are (channels, H*W): lanes = H*W."""
    HW = x_ref.shape[2]

    x2 = x_ref[0]                                            # (C, HW)

    # fc1 (1x1 conv, BN1 folded into the weights) + exact GELU
    h = jnp.dot(w1_ref[...], x2,
                preferred_element_type=jnp.float32) + c1_ref[...]   # (Hd, HW)
    h = _gelu_exact(h)

    # depthwise 3x3 conv (padding=1, groups=hidden), mid-BN folded into taps.
    # Neighbor access = lane-roll of the flattened HW axis (XLU) + a border
    # mask that zeroes wrapped / out-of-image positions.
    acc = h * wm_ref[:, 4:5]                                 # center tap
    for k in range(9):
        if k == 4:
            continue
        dy, dx = k // 3 - 1, k % 3 - 1
        shift = (-(dy * W + dx)) % HW                        # rolled[p] = h[p + dy*W + dx]
        rolled = pltpu.roll(h, shift=shift, axis=1)
        acc = acc + rolled * wm_ref[:, k:k + 1] * mask_ref[k:k + 1, :]

    m = _gelu_exact(acc + cm_ref[...])

    # fc2 (1x1 conv, BN2 + layer_scale folded into weights/bias) + residual
    y = jnp.dot(w2_ref[...], m,
                preferred_element_type=jnp.float32) + c2_ref[...]   # (C, HW)
    o_ref[0] = (x2 + y).astype(o_ref.dtype)


def _dwconv_masks(H, W):
    """(9, H*W) float mask: 1 where the (dy,dx)-shifted neighbor is in-image."""
    h = np.arange(H)[:, None]
    w = np.arange(W)[None, :]
    rows = []
    for ky in range(3):
        for kx in range(3):
            dy, dx = ky - 1, kx - 1
            valid = ((h + dy >= 0) & (h + dy < H) &
                     (w + dx >= 0) & (w + dx < W))
            rows.append(valid.reshape(-1))
    return jnp.asarray(np.stack(rows), dtype=jnp.float32)


def ffn_forward(x_nchw, params):
    """x_nchw: [B, C, H, W] float32. Returns [B, C, H, W]."""
    B, C, H, W = x_nchw.shape
    HW = H * W
    Hd = params["w1"].shape[0]

    xf = x_nchw.reshape(B, C, HW)          # free reshape in HBM (contiguous)
    mask = _dwconv_masks(H, W)             # (9, HW)

    def full(shape):
        return pl.BlockSpec(shape, lambda b, _n=len(shape): (0,) * _n)

    kernel = functools.partial(_ffn_kernel, W=W)

    out = pl.pallas_call(
        kernel,
        out_shape=jax.ShapeDtypeStruct((B, C, HW), x_nchw.dtype),
        grid_spec=pltpu.PrefetchScalarGridSpec(
            num_scalar_prefetch=0,
            grid=(B,),
            in_specs=[
                pl.BlockSpec((1, C, HW), lambda b: (b, 0, 0)),   # x
                full((Hd, C)),                                   # w1 (BN1 folded)
                full((Hd, 1)),                                   # c1
                full((Hd, 9)),                                   # dw 3x3 taps (BNmid folded)
                full((Hd, 1)),                                   # cm
                full((9, HW)),                                   # border masks
                full((C, Hd)),                                   # w2 (BN2+layer_scale folded)
                full((C, 1)),                                    # c2
            ],
            out_specs=pl.BlockSpec((1, C, HW), lambda b: (b, 0, 0)),
        ),
        compiler_params=pltpu.CompilerParams(
            dimension_semantics=("parallel",)),
    )(xf, params["w1"], params["c1"], params["wm"], params["cm"], mask,
      params["w2"], params["c2"])

    return out.reshape(B, C, H, W)


def make_params(key, dim, mlp_ratio=4.0, layer_scale_init=1e-5, eps=1e-5):
    """Deterministic synthetic parameters, pre-folded for the kernel:
       BN scales folded into conv weights, layer_scale folded into fc2."""
    hidden = int(dim * mlp_ratio)
    ks = jax.random.split(key, 15)

    def trunc_normal(k, shape, std=0.02):
        return std * jax.random.truncated_normal(k, -2.0, 2.0, shape, jnp.float32)

    # Raw conv weights (PyTorch shapes, biases init to 0 per _init_weights)
    w1_t = trunc_normal(ks[0], (hidden, dim))       # fc1: Conv2d(dim, hidden, 1)
    b1 = jnp.zeros((hidden,), jnp.float32)
    wm_t = trunc_normal(ks[1], (hidden, 3, 3))      # mid: depthwise 3x3
    bm = jnp.zeros((hidden,), jnp.float32)
    w2_t = trunc_normal(ks[2], (dim, hidden))       # fc2: Conv2d(hidden, dim, 1)
    b2 = jnp.zeros((dim,), jnp.float32)

    def bn_fold(kg, kb, km, kv, ch, conv_bias):
        # eval-mode BatchNorm folded into per-channel scale/shift
        gamma = 1.0 + 0.1 * jax.random.normal(kg, (ch,), jnp.float32)
        beta = 0.1 * jax.random.normal(kb, (ch,), jnp.float32)
        mean = 0.1 * jax.random.normal(km, (ch,), jnp.float32)
        var = 1.0 + 0.1 * jnp.abs(jax.random.normal(kv, (ch,), jnp.float32))
        scale = gamma / jnp.sqrt(var + eps)
        shift = beta - mean * scale + conv_bias * scale
        return scale, shift

    s1, sh1 = bn_fold(ks[3], ks[4], ks[5], ks[6], hidden, b1)
    sm, shm = bn_fold(ks[7], ks[8], ks[9], ks[10], hidden, bm)
    s2, sh2 = bn_fold(ks[11], ks[12], ks[13], ks[14], dim, b2)
    ls = layer_scale_init * jnp.ones((dim,), jnp.float32)

    return dict(
        w1=s1[:, None] * w1_t,                             # (hidden, dim)
        c1=sh1[:, None],                                   # (hidden, 1)
        wm=sm[:, None] * wm_t.reshape(hidden, 9),          # (hidden, 9), k = ky*3+kx
        cm=shm[:, None],                                   # (hidden, 1)
        w2=(ls * s2)[:, None] * w2_t,                      # (dim, hidden)
        c2=(ls * sh2)[:, None],                            # (dim, 1)
    )


def ffn_reference(x_nchw, params):
    """Pure-JAX reference with the same folded-BN / exact-GELU semantics."""
    B, C, H, W = x_nchw.shape
    Hd = params["w1"].shape[0]
    xf = x_nchw.reshape(B, C, H * W)

    h = jnp.einsum("fc,bcp->bfp", params["w1"], xf) + params["c1"]
    h = jax.nn.gelu(h, approximate=False)

    hm = h.reshape(B, Hd, H, W)
    padded = jnp.pad(hm, ((0, 0), (0, 0), (1, 1), (1, 1)))
    acc = jnp.zeros_like(hm)
    for ky in range(3):
        for kx in range(3):
            tap = params["wm"][:, ky * 3 + kx][None, :, None, None]
            acc = acc + padded[:, :, ky:ky + H, kx:kx + W] * tap

    m = acc.reshape(B, Hd, H * W) + params["cm"]
    m = jax.nn.gelu(m, approximate=False)

    y = jnp.einsum("cf,bfp->bcp", params["w2"], m) + params["c2"]
    out = xf + y
    return out.reshape(B, C, H, W)


if __name__ == "__main__":
    key = jax.random.PRNGKey(0)
    kx, kp = jax.random.split(key)

    B, dim, H, W = 2, 4, 16, 16            # mlp_ratio=4 -> hidden=16
    x = jax.random.normal(kx, (B, dim, H, W), jnp.float32)
    params = make_params(kp, dim)

    out = ffn_forward(x, params)
    out = jax.block_until_ready(out)

    ref = ffn_reference(x, params)
    assert out.shape == x.shape
    if not bool(jnp.allclose(out, ref, atol=1e-4, rtol=1e-4)):
        raise AssertionError("Pallas kernel does not match JAX reference")

    print("KERNEL_OK")
</pallas_src>

<mosaic_0001>
module attributes {stable_mosaic.version = 11 : i64} {
  func.func @_ffn_kernel(%arg0: i32, %arg1: memref<1x4x256xf32, #tpu.memory_space<vmem>>, %arg2: memref<16x4xf32, #tpu.memory_space<vmem>>, %arg3: memref<16x1xf32, #tpu.memory_space<vmem>>, %arg4: memref<16x9xf32, #tpu.memory_space<vmem>>, %arg5: memref<16x1xf32, #tpu.memory_space<vmem>>, %arg6: memref<9x256xf32, #tpu.memory_space<vmem>>, %arg7: memref<4x16xf32, #tpu.memory_space<vmem>>, %arg8: memref<4x1xf32, #tpu.memory_space<vmem>>, %arg9: memref<1x4x256xf32, #tpu.memory_space<vmem>>) attributes {dimension_semantics = [#tpu.dimension_semantics<parallel>], iteration_bounds = array<i64: 2>, scalar_prefetch = 0 : i64, scratch_operands = 0 : i64, tpu.core_type = #tpu.core_type<tc>, window_params = [{transform_indices = @transform_0, window_bounds = array<i64: 1, 4, 256>}, {pipeline_mode = #tpu.pipeline_mode<synchronous>, transform_indices = @transform_1, window_bounds = array<i64: 16, 4>}, {pipeline_mode = #tpu.pipeline_mode<synchronous>, transform_indices = @transform_2, window_bounds = array<i64: 16, 1>}, {pipeline_mode = #tpu.pipeline_mode<synchronous>, transform_indices = @transform_3, window_bounds = array<i64: 16, 9>}, {pipeline_mode = #tpu.pipeline_mode<synchronous>, transform_indices = @transform_4, window_bounds = array<i64: 16, 1>}, {pipeline_mode = #tpu.pipeline_mode<synchronous>, transform_indices = @transform_5, window_bounds = array<i64: 9, 256>}, {pipeline_mode = #tpu.pipeline_mode<synchronous>, transform_indices = @transform_6, window_bounds = array<i64: 4, 16>}, {pipeline_mode = #tpu.pipeline_mode<synchronous>, transform_indices = @transform_7, window_bounds = array<i64: 4, 1>}, {transform_indices = @transform_8, window_bounds = array<i64: 1, 4, 256>}]} {
    %c0 = arith.constant 0 : index
    %c0_0 = arith.constant 0 : index
    %c0_1 = arith.constant 0 : index
    %0 = vector.load %arg1[%c0, %c0_0, %c0_1] : memref<1x4x256xf32, #tpu.memory_space<vmem>>, vector<1x4x256xf32>
    %1 = vector.shape_cast %0 : vector<1x4x256xf32> to vector<4x256xf32>
    %c0_2 = arith.constant 0 : index
    %c0_3 = arith.constant 0 : index
    %2 = vector.load %arg2[%c0_2, %c0_3] : memref<16x4xf32, #tpu.memory_space<vmem>>, vector<16x4xf32>
    %cst = arith.constant dense<0.000000e+00> : vector<16x256xf32>
    %3 = tpu.matmul %2, %1, %cst {dimension_numbers = #tpu.dot_dimension_numbers<[1], [0], [0], [1], [0, 0, 1, 1], [], []>} : vector<16x4xf32>, vector<4x256xf32>, vector<16x256xf32> -> vector<16x256xf32>
    %c0_4 = arith.constant 0 : index
    %c0_5 = arith.constant 0 : index
    %4 = vector.load %arg3[%c0_4, %c0_5] : memref<16x1xf32, #tpu.memory_space<vmem>>, vector<16x1xf32>
    %5 = vector.broadcast %4 : vector<16x1xf32> to vector<16x256xf32>
    %6 = arith.addf %3, %5 : vector<16x256xf32>
    %cst_6 = arith.constant 5.000000e-01 : f32
    %7 = vector.broadcast %cst_6 : f32 to vector<16x256xf32>
    %8 = arith.mulf %7, %6 : vector<16x256xf32>
    %cst_7 = arith.constant 0.707106769 : f32
    %9 = vector.broadcast %cst_7 : f32 to vector<16x256xf32>
    %10 = arith.mulf %6, %9 : vector<16x256xf32>
    %11 = math.absf %10 : vector<16x256xf32>
    %cst_8 = arith.constant 0.327591091 : f32
    %12 = vector.broadcast %cst_8 : f32 to vector<16x256xf32>
    %13 = arith.mulf %12, %11 : vector<16x256xf32>
    %cst_9 = arith.constant 1.000000e+00 : f32
    %14 = vector.broadcast %cst_9 : f32 to vector<16x256xf32>
    %15 = arith.addf %14, %13 : vector<16x256xf32>
    %cst_10 = arith.constant 1.000000e+00 : f32
    %16 = vector.broadcast %cst_10 : f32 to vector<16x256xf32>
    %17 = arith.divf %16, %15 : vector<16x256xf32>
    %cst_11 = arith.constant 1.06140542 : f32
    %18 = vector.broadcast %cst_11 : f32 to vector<16x256xf32>
    %19 = arith.mulf %17, %18 : vector<16x256xf32>
    %cst_12 = arith.constant -1.45315206 : f32
    %20 = vector.broadcast %cst_12 : f32 to vector<16x256xf32>
    %21 = arith.addf %20, %19 : vector<16x256xf32>
    %22 = arith.mulf %17, %21 : vector<16x256xf32>
    %cst_13 = arith.constant 1.42141378 : f32
    %23 = vector.broadcast %cst_13 : f32 to vector<16x256xf32>
    %24 = arith.addf %23, %22 : vector<16x256xf32>
    %25 = arith.mulf %17, %24 : vector<16x256xf32>
    %cst_14 = arith.constant -0.284496725 : f32
    %26 = vector.broadcast %cst_14 : f32 to vector<16x256xf32>
    %27 = arith.addf %26, %25 : vector<16x256xf32>
    %28 = arith.mulf %17, %27 : vector<16x256xf32>
    %cst_15 = arith.constant 0.254829586 : f32
    %29 = vector.broadcast %cst_15 : f32 to vector<16x256xf32>
    %30 = arith.addf %29, %28 : vector<16x256xf32>
    %31 = arith.mulf %17, %30 : vector<16x256xf32>
    %cst_16 = arith.constant 0.000000e+00 : f32
    %32 = vector.broadcast %cst_16 : f32 to vector<16x256xf32>
    %33 = arith.subf %32, %11 : vector<16x256xf32>
    %34 = arith.mulf %33, %11 : vector<16x256xf32>
    %35 = math.exp %34 : vector<16x256xf32>
    %36 = arith.mulf %31, %35 : vector<16x256xf32>
    %cst_17 = arith.constant 1.000000e+00 : f32
    %37 = vector.broadcast %cst_17 : f32 to vector<16x256xf32>
    %38 = arith.subf %37, %36 : vector<16x256xf32>
    %cst_18 = arith.constant 0.000000e+00 : f32
    %39 = vector.broadcast %cst_18 : f32 to vector<16x256xf32>
    %40 = arith.cmpf oge, %10, %39 : vector<16x256xf32>
    %cst_19 = arith.constant 0.000000e+00 : f32
    %41 = vector.broadcast %cst_19 : f32 to vector<16x256xf32>
    %42 = arith.subf %41, %38 : vector<16x256xf32>
    %43 = arith.select %40, %38, %42 : vector<16x256xi1>, vector<16x256xf32>
    %cst_20 = arith.constant 1.000000e+00 : f32
    %44 = vector.broadcast %cst_20 : f32 to vector<16x256xf32>
    %45 = arith.addf %44, %43 : vector<16x256xf32>
    %46 = arith.mulf %8, %45 : vector<16x256xf32>
    %c0_21 = arith.constant 0 : index
    %c4 = arith.constant 4 : index
    %47 = vector.load %arg4[%c0_21, %c4] : memref<16x9xf32, #tpu.memory_space<vmem>>, vector<16x1xf32>
    %48 = vector.broadcast %47 : vector<16x1xf32> to vector<16x256xf32>
    %49 = arith.mulf %46, %48 : vector<16x256xf32>
    %c17_i32 = arith.constant 17 : i32
    %50 = tpu.dynamic_rotate %46 by %c17_i32 dim 1 : vector<16x256xf32>, i32 -> vector<16x256xf32>
    %c0_22 = arith.constant 0 : index
    %c0_23 = arith.constant 0 : index
    %51 = vector.load %arg4[%c0_22, %c0_23] : memref<16x9xf32, #tpu.memory_space<vmem>>, vector<16x1xf32>
    %52 = vector.broadcast %51 : vector<16x1xf32> to vector<16x256xf32>
    %53 = arith.mulf %50, %52 : vector<16x256xf32>
    %c0_24 = arith.constant 0 : index
    %c0_25 = arith.constant 0 : index
    %54 = vector.load %arg6[%c0_24, %c0_25] : memref<9x256xf32, #tpu.memory_space<vmem>>, vector<1x256xf32>
    %55 = vector.broadcast %54 : vector<1x256xf32> to vector<16x256xf32>
    %56 = arith.mulf %53, %55 : vector<16x256xf32>
    %57 = arith.addf %49, %56 : vector<16x256xf32>
    %c16_i32 = arith.constant 16 : i32
    %58 = tpu.dynamic_rotate %46 by %c16_i32 dim 1 : vector<16x256xf32>, i32 -> vector<16x256xf32>
    %c0_26 = arith.constant 0 : index
    %c1 = arith.constant 1 : index
    %59 = vector.load %arg4[%c0_26, %c1] : memref<16x9xf32, #tpu.memory_space<vmem>>, vector<16x1xf32>
    %60 = vector.broadcast %59 : vector<16x1xf32> to vector<16x256xf32>
    %61 = arith.mulf %58, %60 : vector<16x256xf32>
    %c1_27 = arith.constant 1 : index
    %c0_28 = arith.constant 0 : index
    %62 = vector.load %arg6[%c1_27, %c0_28] : memref<9x256xf32, #tpu.memory_space<vmem>>, vector<1x256xf32>
    %63 = vector.broadcast %62 : vector<1x256xf32> to vector<16x256xf32>
    %64 = arith.mulf %61, %63 : vector<16x256xf32>
    %65 = arith.addf %57, %64 : vector<16x256xf32>
    %c15_i32 = arith.constant 15 : i32
    %66 = tpu.dynamic_rotate %46 by %c15_i32 dim 1 : vector<16x256xf32>, i32 -> vector<16x256xf32>
    %c0_29 = arith.constant 0 : index
    %c2 = arith.constant 2 : index
    %67 = vector.load %arg4[%c0_29, %c2] : memref<16x9xf32, #tpu.memory_space<vmem>>, vector<16x1xf32>
    %68 = vector.broadcast %67 : vector<16x1xf32> to vector<16x256xf32>
    %69 = arith.mulf %66, %68 : vector<16x256xf32>
    %c2_30 = arith.constant 2 : index
    %c0_31 = arith.constant 0 : index
    %70 = vector.load %arg6[%c2_30, %c0_31] : memref<9x256xf32, #tpu.memory_space<vmem>>, vector<1x256xf32>
    %71 = vector.broadcast %70 : vector<1x256xf32> to vector<16x256xf32>
    %72 = arith.mulf %69, %71 : vector<16x256xf32>
    %73 = arith.addf %65, %72 : vector<16x256xf32>
    %c1_i32 = arith.constant 1 : i32
    %74 = tpu.dynamic_rotate %46 by %c1_i32 dim 1 : vector<16x256xf32>, i32 -> vector<16x256xf32>
    %c0_32 = arith.constant 0 : index
    %c3 = arith.constant 3 : index
    %75 = vector.load %arg4[%c0_32, %c3] : memref<16x9xf32, #tpu.memory_space<vmem>>, vector<16x1xf32>
    %76 = vector.broadcast %75 : vector<16x1xf32> to vector<16x256xf32>
    %77 = arith.mulf %74, %76 : vector<16x256xf32>
    %c3_33 = arith.constant 3 : index
    %c0_34 = arith.constant 0 : index
    %78 = vector.load %arg6[%c3_33, %c0_34] : memref<9x256xf32, #tpu.memory_space<vmem>>, vector<1x256xf32>
    %79 = vector.broadcast %78 : vector<1x256xf32> to vector<16x256xf32>
    %80 = arith.mulf %77, %79 : vector<16x256xf32>
    %81 = arith.addf %73, %80 : vector<16x256xf32>
    %c255_i32 = arith.constant 255 : i32
    %82 = tpu.dynamic_rotate %46 by %c255_i32 dim 1 : vector<16x256xf32>, i32 -> vector<16x256xf32>
    %c0_35 = arith.constant 0 : index
    %c5 = arith.constant 5 : index
    %83 = vector.load %arg4[%c0_35, %c5] : memref<16x9xf32, #tpu.memory_space<vmem>>, vector<16x1xf32>
    %84 = vector.broadcast %83 : vector<16x1xf32> to vector<16x256xf32>
    %85 = arith.mulf %82, %84 : vector<16x256xf32>
    %c5_36 = arith.constant 5 : index
    %c0_37 = arith.constant 0 : index
    %86 = vector.load %arg6[%c5_36, %c0_37] : memref<9x256xf32, #tpu.memory_space<vmem>>, vector<1x256xf32>
    %87 = vector.broadcast %86 : vector<1x256xf32> to vector<16x256xf32>
    %88 = arith.mulf %85, %87 : vector<16x256xf32>
    %89 = arith.addf %81, %88 : vector<16x256xf32>
    %c241_i32 = arith.constant 241 : i32
    %90 = tpu.dynamic_rotate %46 by %c241_i32 dim 1 : vector<16x256xf32>, i32 -> vector<16x256xf32>
    %c0_38 = arith.constant 0 : index
    %c6 = arith.constant 6 : index
    %91 = vector.load %arg4[%c0_38, %c6] : memref<16x9xf32, #tpu.memory_space<vmem>>, vector<16x1xf32>
    %92 = vector.broadcast %91 : vector<16x1xf32> to vector<16x256xf32>
    %93 = arith.mulf %90, %92 : vector<16x256xf32>
    %c6_39 = arith.constant 6 : index
    %c0_40 = arith.constant 0 : index
    %94 = vector.load %arg6[%c6_39, %c0_40] : memref<9x256xf32, #tpu.memory_space<vmem>>, vector<1x256xf32>
    %95 = vector.broadcast %94 : vector<1x256xf32> to vector<16x256xf32>
    %96 = arith.mulf %93, %95 : vector<16x256xf32>
    %97 = arith.addf %89, %96 : vector<16x256xf32>
    %c240_i32 = arith.constant 240 : i32
    %98 = tpu.dynamic_rotate %46 by %c240_i32 dim 1 : vector<16x256xf32>, i32 -> vector<16x256xf32>
    %c0_41 = arith.constant 0 : index
    %c7 = arith.constant 7 : index
    %99 = vector.load %arg4[%c0_41, %c7] : memref<16x9xf32, #tpu.memory_space<vmem>>, vector<16x1xf32>
    %100 = vector.broadcast %99 : vector<16x1xf32> to vector<16x256xf32>
    %101 = arith.mulf %98, %100 : vector<16x256xf32>
    %c7_42 = arith.constant 7 : index
    %c0_43 = arith.constant 0 : index
    %102 = vector.load %arg6[%c7_42, %c0_43] : memref<9x256xf32, #tpu.memory_space<vmem>>, vector<1x256xf32>
    %103 = vector.broadcast %102 : vector<1x256xf32> to vector<16x256xf32>
    %104 = arith.mulf %101, %103 : vector<16x256xf32>
    %105 = arith.addf %97, %104 : vector<16x256xf32>
    %c239_i32 = arith.constant 239 : i32
    %106 = tpu.dynamic_rotate %46 by %c239_i32 dim 1 : vector<16x256xf32>, i32 -> vector<16x256xf32>
    %c0_44 = arith.constant 0 : index
    %c8 = arith.constant 8 : index
    %107 = vector.load %arg4[%c0_44, %c8] : memref<16x9xf32, #tpu.memory_space<vmem>>, vector<16x1xf32>
    %108 = vector.broadcast %107 : vector<16x1xf32> to vector<16x256xf32>
    %109 = arith.mulf %106, %108 : vector<16x256xf32>
    %c8_45 = arith.constant 8 : index
    %c0_46 = arith.constant 0 : index
    %110 = vector.load %arg6[%c8_45, %c0_46] : memref<9x256xf32, #tpu.memory_space<vmem>>, vector<1x256xf32>
    %111 = vector.broadcast %110 : vector<1x256xf32> to vector<16x256xf32>
    %112 = arith.mulf %109, %111 : vector<16x256xf32>
    %113 = arith.addf %105, %112 : vector<16x256xf32>
    %c0_47 = arith.constant 0 : index
    %c0_48 = arith.constant 0 : index
    %114 = vector.load %arg5[%c0_47, %c0_48] : memref<16x1xf32, #tpu.memory_space<vmem>>, vector<16x1xf32>
    %115 = vector.broadcast %114 : vector<16x1xf32> to vector<16x256xf32>
    %116 = arith.addf %113, %115 : vector<16x256xf32>
    %cst_49 = arith.constant 5.000000e-01 : f32
    %117 = vector.broadcast %cst_49 : f32 to vector<16x256xf32>
    %118 = arith.mulf %117, %116 : vector<16x256xf32>
    %cst_50 = arith.constant 0.707106769 : f32
    %119 = vector.broadcast %cst_50 : f32 to vector<16x256xf32>
    %120 = arith.mulf %116, %119 : vector<16x256xf32>
    %121 = math.absf %120 : vector<16x256xf32>
    %cst_51 = arith.constant 0.327591091 : f32
    %122 = vector.broadcast %cst_51 : f32 to vector<16x256xf32>
    %123 = arith.mulf %122, %121 : vector<16x256xf32>
    %cst_52 = arith.constant 1.000000e+00 : f32
    %124 = vector.broadcast %cst_52 : f32 to vector<16x256xf32>
    %125 = arith.addf %124, %123 : vector<16x256xf32>
    %cst_53 = arith.constant 1.000000e+00 : f32
    %126 = vector.broadcast %cst_53 : f32 to vector<16x256xf32>
    %127 = arith.divf %126, %125 : vector<16x256xf32>
    %cst_54 = arith.constant 1.06140542 : f32
    %128 = vector.broadcast %cst_54 : f32 to vector<16x256xf32>
    %129 = arith.mulf %127, %128 : vector<16x256xf32>
    %cst_55 = arith.constant -1.45315206 : f32
    %130 = vector.broadcast %cst_55 : f32 to vector<16x256xf32>
    %131 = arith.addf %130, %129 : vector<16x256xf32>
    %132 = arith.mulf %127, %131 : vector<16x256xf32>
    %cst_56 = arith.constant 1.42141378 : f32
    %133 = vector.broadcast %cst_56 : f32 to vector<16x256xf32>
    %134 = arith.addf %133, %132 : vector<16x256xf32>
    %135 = arith.mulf %127, %134 : vector<16x256xf32>
    %cst_57 = arith.constant -0.284496725 : f32
    %136 = vector.broadcast %cst_57 : f32 to vector<16x256xf32>
    %137 = arith.addf %136, %135 : vector<16x256xf32>
    %138 = arith.mulf %127, %137 : vector<16x256xf32>
    %cst_58 = arith.constant 0.254829586 : f32
    %139 = vector.broadcast %cst_58 : f32 to vector<16x256xf32>
    %140 = arith.addf %139, %138 : vector<16x256xf32>
    %141 = arith.mulf %127, %140 : vector<16x256xf32>
    %cst_59 = arith.constant 0.000000e+00 : f32
    %142 = vector.broadcast %cst_59 : f32 to vector<16x256xf32>
    %143 = arith.subf %142, %121 : vector<16x256xf32>
    %144 = arith.mulf %143, %121 : vector<16x256xf32>
    %145 = math.exp %144 : vector<16x256xf32>
    %146 = arith.mulf %141, %145 : vector<16x256xf32>
    %cst_60 = arith.constant 1.000000e+00 : f32
    %147 = vector.broadcast %cst_60 : f32 to vector<16x256xf32>
    %148 = arith.subf %147, %146 : vector<16x256xf32>
    %cst_61 = arith.constant 0.000000e+00 : f32
    %149 = vector.broadcast %cst_61 : f32 to vector<16x256xf32>
    %150 = arith.cmpf oge, %120, %149 : vector<16x256xf32>
    %cst_62 = arith.constant 0.000000e+00 : f32
    %151 = vector.broadcast %cst_62 : f32 to vector<16x256xf32>
    %152 = arith.subf %151, %148 : vector<16x256xf32>
    %153 = arith.select %150, %148, %152 : vector<16x256xi1>, vector<16x256xf32>
    %cst_63 = arith.constant 1.000000e+00 : f32
    %154 = vector.broadcast %cst_63 : f32 to vector<16x256xf32>
    %155 = arith.addf %154, %153 : vector<16x256xf32>
    %156 = arith.mulf %118, %155 : vector<16x256xf32>
    %c0_64 = arith.constant 0 : index
    %c0_65 = arith.constant 0 : index
    %157 = vector.load %arg7[%c0_64, %c0_65] : memref<4x16xf32, #tpu.memory_space<vmem>>, vector<4x16xf32>
    %cst_66 = arith.constant dense<0.000000e+00> : vector<4x256xf32>
    %158 = tpu.matmul %157, %156, %cst_66 {dimension_numbers = #tpu.dot_dimension_numbers<[1], [0], [0], [1], [0, 0, 1, 1], [], []>} : vector<4x16xf32>, vector<16x256xf32>, vector<4x256xf32> -> vector<4x256xf32>
    %c0_67 = arith.constant 0 : index
    %c0_68 = arith.constant 0 : index
    %159 = vector.load %arg8[%c0_67, %c0_68] : memref<4x1xf32, #tpu.memory_space<vmem>>, vector<4x1xf32>
    %160 = vector.broadcast %159 : vector<4x1xf32> to vector<4x256xf32>
    %161 = arith.addf %158, %160 : vector<4x256xf32>
    %162 = arith.addf %1, %161 : vector<4x256xf32>
    %c0_69 = arith.constant 0 : index
    %c0_70 = arith.constant 0 : index
    %c0_71 = arith.constant 0 : index
    %163 = vector.load %arg9[%c0_69, %c0_70, %c0_71] : memref<1x4x256xf32, #tpu.memory_space<vmem>>, vector<1x4x256xf32>
    %164 = vector.shape_cast %163 : vector<1x4x256xf32> to vector<4x256xf32>
    %165 = vector.shape_cast %162 : vector<4x256xf32> to vector<1x4x256xf32>
    tpu.vector_store %arg9[%c0_69, %c0_70, %c0_71], %165 {strides = array<i32>} : memref<1x4x256xf32, #tpu.memory_space<vmem>>, vector<1x4x256xf32>,
    return
  }
  func.func @transform_0(%arg0: i32) -> (i32, i32, i32) {
    %c0_i32 = arith.constant 0 : i32
    %c0_i32_0 = arith.constant 0 : i32
    %c0_i32_1 = arith.constant 0 : i32
    return %arg0, %c0_i32, %c0_i32_0 : i32, i32, i32
  }
  func.func @transform_1(%arg0: i32) -> (i32, i32) {
    %c0_i32 = arith.constant 0 : i32
    %c0_i32_0 = arith.constant 0 : i32
    %c0_i32_1 = arith.constant 0 : i32
    return %c0_i32, %c0_i32_0 : i32, i32
  }
  func.func @transform_2(%arg0: i32) -> (i32, i32) {
    %c0_i32 = arith.constant 0 : i32
    %c0_i32_0 = arith.constant 0 : i32
    %c0_i32_1 = arith.constant 0 : i32
    return %c0_i32, %c0_i32_0 : i32, i32
  }
  func.func @transform_3(%arg0: i32) -> (i32, i32) {
    %c0_i32 = arith.constant 0 : i32
    %c0_i32_0 = arith.constant 0 : i32
    %c0_i32_1 = arith.constant 0 : i32
    return %c0_i32, %c0_i32_0 : i32, i32
  }
  func.func @transform_4(%arg0: i32) -> (i32, i32) {
    %c0_i32 = arith.constant 0 : i32
    %c0_i32_0 = arith.constant 0 : i32
    %c0_i32_1 = arith.constant 0 : i32
    return %c0_i32, %c0_i32_0 : i32, i32
  }
  func.func @transform_5(%arg0: i32) -> (i32, i32) {
    %c0_i32 = arith.constant 0 : i32
    %c0_i32_0 = arith.constant 0 : i32
    %c0_i32_1 = arith.constant 0 : i32
    return %c0_i32, %c0_i32_0 : i32, i32
  }
  func.func @transform_6(%arg0: i32) -> (i32, i32) {
    %c0_i32 = arith.constant 0 : i32
    %c0_i32_0 = arith.constant 0 : i32
    %c0_i32_1 = arith.constant 0 : i32
    return %c0_i32, %c0_i32_0 : i32, i32
  }
  func.func @transform_7(%arg0: i32) -> (i32, i32) {
    %c0_i32 = arith.constant 0 : i32
    %c0_i32_0 = arith.constant 0 : i32
    %c0_i32_1 = arith.constant 0 : i32
    return %c0_i32, %c0_i32_0 : i32, i32
  }
  func.func @transform_8(%arg0: i32) -> (i32, i32, i32) {
    %c0_i32 = arith.constant 0 : i32
    %c0_i32_0 = arith.constant 0 : i32
    %c0_i32_1 = arith.constant 0 : i32
    return %arg0, %c0_i32, %c0_i32_0 : i32, i32, i32
  }
}

</mosaic_0001>

<bundles_post_ra>
// kernel: tpu_custom_call.1
= control target key start
LH: loop header
LB: loop body
LE: loop exit
PB: predicated region body
PF: predicated region fallthrough
CT: control target
= control target key end

     0   :  { %13 = vsyncpa [#allocation3], 0  ;;  %s1991_s0 = inlined_call_operand.vmem [shape: f32[2,4,256], index: 0, kind: input, shape index: {}]   ;;  %s1992_s1 = inlined_call_operand.vmem [shape: f32[16,4], index: 1, kind: input, shape index: {}]   ;;  %s1993_s2 = inlined_call_operand.vmem [shape: f32[16,1], index: 2, kind: input, shape index: {}]   ;;  %s1994_s3 = inlined_call_operand.vmem [shape: f32[16,9], index: 3, kind: input, shape index: {}]   ;;  %s1995_s4 = inlined_call_operand.vmem [shape: f32[16,1], index: 4, kind: input, shape index: {}]   ;;  %s1996_s5 = inlined_call_operand.vmem [shape: f32[9,256], index: 5, kind: input, shape index: {}]   ;;  %s1997_s6 = inlined_call_operand.vmem [shape: f32[4,16], index: 6, kind: input, shape index: {}]   ;;  %s1998_s7 = inlined_call_operand.vmem [shape: f32[4,1], index: 7, kind: input, shape index: {}]   ;;  %s1999_s8 = inlined_call_operand.hbm [shape: f32[2,4,256], index: 8, kind: output, shape index: {}]  }
   0x1   :  { %15 = vsyncpa [#allocation3 + $0x1], 0  ;;  %s1457_s27 = smov 0   ;;  %s1459_s28 = smov 0  }
   0x2   :  { %s1461_s29 = smov 0   ;;  %s1463_s30 = smov 0  }
   0x3 LB: > { %s1478_s9 = sadd.s32 4294967295, %s1391_s30   ;;  %s1189_s10 = sadd.s32 4294967294, %s1391_s30   ;;  %s1391_s30 = sphi %s1463_s30, %s2005_s30   ;;  %s1387_s29 = sphi %s1461_s29, %s2004_s29   ;;  %s1383_s28 = sphi %s1459_s28, %s2003_s28   ;;  %s1379_s27 = sphi %s1457_s27, %s2002_s27  }
   0x4   : > { %s1482_s11 = sadd.s32 1, %s1391_s30   ;;  %s201_s12 = sadd.s32 1, %s1387_s29 }
   0x5   : > { %s198_s13 = ssub.s32 %s1391_s30, %s1482_s11  ;;  %p211_p0 = scmp.ne.s32.totalorder %s1387_s29, %s1383_s28 }
   0x6   : > { %p199_p1 = scmp.eq.s32.totalorder %s198_s13, 0  ;;  %p212_p2 = scmp.eq.s32.totalorder %s1478_s9, 1 }
   0x7   : > { %p217_p3 = scmp.ne.s32.totalorder %s1383_s28, %s1379_s27  ;;  %p218_p4 = scmp.eq.s32.totalorder %s1189_s10, 1 }
   0x8   : > { %s1493_s14 = scalar_select %p199_p1, %s1387_s29, %s201_s12  }
   0x9   : > { %p1495_p5 = por %p212_p2, %p211_p0  ;;  %p1499_p6 = por %p218_p4, %p217_p3 }
   0xa   : > { %p1192_p7 = scmp.ge.s32.totalorder %s1391_s30, 1  ;;  %p265_p8 = scmp.lt.s32.totalorder %s1391_s30, 3 }
   0xc   : > { %p266_p9 = pnand %p1192_p7, %p265_p8 }
   0xd   : > { %p299_p10 = scmp.lt.s32.totalorder (!%p266_p9), %s1478_s9, 1  ;;  %v1393_v0 = vmov (!%p266_p9), 0.0   ;;  %v307_v1 = vld [vmem:[%s1993_s2] sm:$0xff] (!%p266_p9)  ;;  %v1394_v3 = vmov (!%p266_p9), 0   ;;  %v308_v4 = vld [vmem:[%s1993_s2 + $0x8] sm:$0xff] (!%p266_p9)  ;;  %vm328_vm0 = vcmask (!%p266_p9), 1043456  }
   0xe   : > { %269 = sbr.rel (%p266_p9) target bundleno = 782 (0x30e), region = 52  ;;  %397 = vmatprep.mubr.f32.mxu0 (!%p266_p9), %v1393_v0  ;;  %v518_v2 = vld [vmem:[%s1994_s3] sm:$0xff] (!%p266_p9)  ;;  %1102 = vmatprep.mubr.f32.mxu1 (!%p266_p9), %v1393_v0  ;;  %v519_v5 = vld [vmem:[%s1994_s3 + $0x8] sm:$0xff] (!%p266_p9)  ;;  %vm321_vm1 = vcmask (!%p266_p9), 31744   ;;  %v1395_v9 = vmov (!%p266_p9), 4   ;;  %v1396_v11 = vmov (!%p266_p9), 1  }
   0xf   : > { %1276 = vset.pattern.permute.xlu0 (!%p266_p9), %v1394_v3  ;;  %1277 = vset.pattern.permute.xlu1 (!%p266_p9), %v1394_v3  ;;  %v305_v8 = vld [vmem:[%s1992_s1] sm:$0xff] (!%p266_p9)  ;;  %v306_v10 = vld [vmem:[%s1992_s1 + $0x8] sm:$0xff] (!%p266_p9)  ;;  %v1397_v12 = vmov (!%p266_p9), 2   ;;  %v1398_v13 = vmov (!%p266_p9), 3   ;;  %v1399_v14 = vmov (!%p266_p9), 5   ;;  %v1400_v15 = vmov (!%p266_p9), 6  }
  0x10   : > { %311 = vperm.xlu0 (!%p266_p9), %1276, %v307_v1   ;;  %550 = vperm.xlu1 (!%p266_p9), %1277, %v518_v2   ;;  %v1401_v16 = vmov (!%p266_p9), 7   ;;  %v1402_v17 = vmov (!%p266_p9), 8   ;;  %s1405_s23 = smov (!%p266_p9), 15   ;;  %s1406_s24 = smov (!%p266_p9), 1  }
  0x11   : > { %s1407_s25 = smov (!%p266_p9), 127   ;;  %s1408_s26 = smov (!%p266_p9), 113  }
  0x12   : > { %s1409_s10 = smov (!%p266_p9), 112   ;;  %s1410_s12 = smov (!%p266_p9), 111  }
  0x13   : > { %s296_s17 = sand.u32 (!%p266_p9), 1, %s1383_s28   ;;  %s1214_s19 = sshll.u32 (!%p266_p9), %s1478_s9, 7 }
  0x14   : > { %316 = vperm.xlu0 (!%p266_p9), %1276, %v308_v4   ;;  %554 = vperm.xlu1 (!%p266_p9), %1277, %v519_v5   ;;  %s1193_s18 = sshll.u32 (!%p266_p9), %s296_s17, 3 }
  0x15   : > { %s300_s21 = scalar_select %p299_p10, %s1478_s9, 1 }
  0x16   : > { %s298_s20 = scalar_lea.vmem [#allocation2], %s1193_s18  ;;  %s1411_s9 = smov [#allocation2]  }
  0x17   : > { %s1213_s22 = sshll.u32 %s300_s21, 3  ;;  %s1403_s21 = smov 16  }
  0x18   : > { %s1522_s13 = scalar_lea.vmem %s1991_s0, %s1213_s22  ;;  %1278 = vset.pattern.permute.xlu0 %v1395_v9  ;;  %1279 = vset.pattern.permute.xlu1 %v1395_v9  ;;  %s1404_s22 = smov 17  }
  0x19   : > { %v304_v6 = vld [vmem:[%s1522_s13] sm:$0xff]  ;;  %522 = vperm.xlu0 %1278, %v518_v2   ;;  %527 = vperm.xlu1 %1279, %v519_v5  }
  0x1a   : > { %v320_v7 = vcombine.high %v304_v6, %v304_v6 }
  0x1c   : > { %1196 = vmatprep.subr.msk.mxu0 %vm328_vm0, %v320_v7 }
  0x1d   : > { %1197 = vmatpush1.msk.msra.mxu0 %vm328_vm0, %v304_v6  ;;  %1281 = vset.pattern.permute.xlu0 %v1396_v11 }
  0x1e   : > { %1198 = vmatmul.mubr.msk.f32.vlgmr.msra.gmra.mrb[0].mxu0 %vm321_vm1, %v305_v8  ;;  %599 = vperm.xlu0 %1281, %v519_v5  }
  0x1f   : > { %403 = vmatprep.mubr.f32.mxu0 %v1393_v0  ;;  %1280 = vset.pattern.permute.xlu1 %v1396_v11 }
  0x20   : > { %595 = vperm.xlu1 %1280, %v518_v2  }
  0x22   : > { %1199 = vmatmul.mubr.msk.f32.gmra.mrb[2].mxu0 %vm321_vm1, %v306_v10  ;;  %1283 = vset.pattern.permute.xlu0 %v1398_v13 }
  0x23   : > { %687 = vperm.xlu0 %1283, %v518_v2  }
  0x24   : > { %1282 = vset.pattern.permute.xlu1 %v1397_v12 }
  0x25   : > { %641 = vperm.xlu1 %1282, %v518_v2  }
  0x27   : > { %1286 = vset.pattern.permute.xlu0 %v1399_v14 }
  0x28   : > { %737 = vperm.xlu0 %1286, %v519_v5  }
  0x29   : > { %645 = vperm.xlu1 %1282, %v519_v5  }
  0x2c   : > { %1287 = vset.pattern.permute.xlu0 %v1400_v15 }
  0x2d   : > { %1284 = vset.pattern.permute.xlu1 %v1398_v13  ;;  %779 = vperm.xlu0 %1287, %v518_v2  }
  0x2e   : > { %691 = vperm.xlu1 %1284, %v519_v5  }
  0x31   : > { %1290 = vset.pattern.permute.xlu0 %v1401_v16 }
  0x32   : > { %1285 = vset.pattern.permute.xlu1 %v1399_v14  ;;  %829 = vperm.xlu0 %1290, %v519_v5  }
  0x33   : > { %733 = vperm.xlu1 %1285, %v518_v2  }
  0x36   : > { %1291 = vset.pattern.permute.xlu0 %v1402_v17 }
  0x37   : > { %1288 = vset.pattern.permute.xlu1 %v1400_v15  ;;  %871 = vperm.xlu0 %1291, %v518_v2  }
  0x38   : > { %783 = vperm.xlu1 %1288, %v519_v5  }
  0x3b   : > { %1294 = vset.pattern.permute.xlu0 %v1394_v3 }
  0x3c   : > { %1289 = vset.pattern.permute.xlu1 %v1401_v16 }
  0x3d   : > { %825 = vperm.xlu1 %1289, %v518_v2  }
  0x41   : > { %1292 = vset.pattern.permute.xlu1 %v1402_v17 }
  0x42   : > { %875 = vperm.xlu1 %1292, %v519_v5  }
  0x46   : > { %1293 = vset.pattern.permute.xlu1 %v1394_v3 }
  0x8f   : > { %v312_v18 = vpop.permute.xlu0 %311 }
  0x93   : > { %v317_v24 = vpop.permute.xlu0 %316 }
  0xf1   : > { %v399_v19 = vpop.f32.mrb[0].mxu0 }
  0xf2   : > { %v1531_v20 = vadd.f32 %v399_v19, %v312_v18  ;;  %v401_v21 = vpop.f32.mrb[1].mxu0 }
  0xf3   : > { %v1533_v22 = vadd.f32 %v401_v21, %v312_v18 }
  0xf4   : > { %v1536_v23 = vmul.f32 0.70710677, %v1531_v20 }
  0xf5   : > { %v1539_v25 = vmul.f32 0.70710677, %v1533_v22  ;;  %v405_v26 = vpop.f32.mrb[2].mxu0 }
  0xf6   : > { %v418_v27 = vand.u32 2147483647, %v1536_v23  ;;  %v1542_v28 = vadd.f32 %v405_v26, %v317_v24  ;;  %v407_v29 = vpop.f32.mrb[3].mxu0  ;;  %vm498_vm2 = vcmp.ge.f32.partialorder %v1536_v23, 0.0 }
  0xf7   : > { %v419_v30 = vand.u32 2147483647, %v1539_v25  ;;  %v1545_v31 = vadd.f32 %v407_v29, %v317_v24  ;;  %vm499_vm3 = vcmp.ge.f32.partialorder %v1539_v25, 0.0 }
  0xf8   : > { %v422_v32 = vmul.f32 0.3275911, %v418_v27  ;;  %v1548_v33 = vmul.f32 0.70710677, %v1542_v28  ;;  %v474_v44 = vsub.f32 0.0, %v418_v27  ;;  %v412_v25 = vmul.f32 0.5, %v1542_v28 }
  0xf9   : > { %v423_v34 = vmul.f32 0.3275911, %v419_v30  ;;  %v1551_v35 = vmul.f32 0.70710677, %v1545_v31  ;;  %v475_v45 = vsub.f32 0.0, %v419_v30 }
  0xfa   : > { %v426_v36 = vadd.f32 1.0, %v422_v32  ;;  %v420_v37 = vand.u32 2147483647, %v1548_v33  ;;  %v478_v47 = vmul.f32 %v474_v44, %v418_v27  ;;  %vm500_vm4 = vcmp.ge.f32.partialorder %v1548_v33, 0.0 }
  0xfb   : > { %v427_v38 = vadd.f32 1.0, %v423_v34  ;;  %v421_v39 = vand.u32 2147483647, %v1551_v35  ;;  %v479_v51 = vmul.f32 %v475_v45, %v419_v30  ;;  %vm501_vm5 = vcmp.ge.f32.partialorder %v1551_v35, 0.0 }
  0xfc   : > { %1296 = vrcp.f32 %v426_v36  ;;  %v424_v40 = vmul.f32 0.3275911, %v420_v37  ;;  %v476_v48 = vsub.f32 0.0, %v420_v37  ;;  %v482_v56 = vmul.f32 1.442695, %v478_v47 }
  0xfd   : > { %1298 = vrcp.f32 %v427_v38  ;;  %v425_v41 = vmul.f32 0.3275911, %v421_v39  ;;  %v477_v52 = vsub.f32 0.0, %v421_v39  ;;  %v484_v61 = vmul.f32 1.442695, %v479_v51 }
  0xfe   : > { %v428_v42 = vadd.f32 1.0, %v424_v40  ;;  %v480_v58 = vmul.f32 %v476_v48, %v420_v37  ;;  %v1555_v40 = vpop.permute.xlu1 %550  ;;  %v413_v33 = vmul.f32 0.5, %v1545_v31  ;;  %v904_v31 = vld [vmem:[%s1995_s4 + $0x8] sm:$0xff] }
  0xff   : > { %v429_v43 = vadd.f32 1.0, %v425_v41  ;;  %v481_v63 = vmul.f32 %v477_v52, %v421_v39 }
 0x100   : > { %1300 = vrcp.f32 %v428_v42  ;;  %v486_v5 = vmul.f32 1.442695, %v480_v58 }
 0x101   : > { %1302 = vrcp.f32 %v429_v43  ;;  %v488_v9 = vmul.f32 1.442695, %v481_v63 }
 0x102   : > { %1304 = vpow2.f32 %v482_v56  ;;  %v1559_v56 = vpop.permute.xlu1 %554 }
 0x103   : > { %1306 = vpow2.f32 %v484_v61 }
 0x104   : > { %1308 = vpow2.f32 %v486_v5 }
 0x105   : > { %1310 = vpow2.f32 %v488_v9  ;;  %v903_v9 = vld [vmem:[%s1995_s4] sm:$0xff] }
 0x106   : > { %v1297_v46 = vpop.eup %1296 }
 0x107   : > { %v1299_v49 = vpop.eup %1298  ;;  %v438_v50 = vmul.f32 1.0614054, %v1297_v46 }
 0x108   : > { %v439_v53 = vmul.f32 1.0614054, %v1299_v49 }
 0x109   : > { %v442_v54 = vadd.f32 -1.4531521, %v438_v50 }
 0x10a   : > { %v1301_v55 = vpop.eup %1300  ;;  %v443_v57 = vadd.f32 -1.4531521, %v439_v53 }
 0x10b   : > { %v1303_v59 = vpop.eup %1302  ;;  %v446_v60 = vmul.f32 %v1297_v46, %v442_v54  ;;  %v440_v62 = vmul.f32 1.0614054, %v1301_v55 }
 0x10c   : > { %v447_v0 = vmul.f32 %v1299_v49, %v443_v57  ;;  %v441_v1 = vmul.f32 1.0614054, %v1303_v59  ;;  %v1305_v32 = vpop.eup %1304  ;;  %v410_v57 = vmul.f32 0.5, %v1531_v20 }
 0x10d   : > { %v450_v2 = vadd.f32 1.4214138, %v446_v60  ;;  %v444_v3 = vadd.f32 -1.4531521, %v440_v62  ;;  %v1307_v37 = vpop.eup %1306 }
 0x10e   : > { %v451_v4 = vadd.f32 1.4214138, %v447_v0  ;;  %v445_v6 = vadd.f32 -1.4531521, %v441_v1  ;;  %v1309_v45 = vpop.eup %1308  ;;  %v411_v0 = vmul.f32 0.5, %v1533_v22  ;;  %v528_v22 = vpop.permute.xlu1 %527 }
 0x10f   : > { %v454_v7 = vmul.f32 %v1297_v46, %v450_v2  ;;  %v448_v8 = vmul.f32 %v1301_v55, %v444_v3  ;;  %v1311_v50 = vpop.eup %1310 }
 0x110   : > { %v455_v10 = vmul.f32 %v1299_v49, %v451_v4  ;;  %v449_v11 = vmul.f32 %v1303_v59, %v445_v6 }
 0x111   : > { %v458_v12 = vadd.f32 -0.28449672, %v454_v7  ;;  %v452_v13 = vadd.f32 1.4214138, %v448_v8 }
 0x112   : > { %v459_v14 = vadd.f32 -0.28449672, %v455_v10  ;;  %v453_v15 = vadd.f32 1.4214138, %v449_v11  ;;  %v1604_v8 = vpop.permute.xlu1 %595  ;;  %v1028_v11 = vld [vmem:[%s1998_s7] sm:$0xf] }
 0x113   : > { %v462_v16 = vmul.f32 %v1297_v46, %v458_v12  ;;  %v456_v17 = vmul.f32 %v1301_v55, %v452_v13 }
 0x114   : > { %v463_v18 = vmul.f32 %v1299_v49, %v459_v14  ;;  %v457_v19 = vmul.f32 %v1303_v59, %v453_v15 }
 0x115   : > { %v466_v21 = vadd.f32 0.2548296, %v462_v16  ;;  %v460_v24 = vadd.f32 -0.28449672, %v456_v17 }
 0x116   : > { %v467_v26 = vadd.f32 0.2548296, %v463_v18  ;;  %v461_v27 = vadd.f32 -0.28449672, %v457_v19  ;;  %v642_v10 = vpop.permute.xlu1 %641 }
 0x117   : > { %v470_v29 = vmul.f32 %v1297_v46, %v466_v21  ;;  %v464_v30 = vmul.f32 %v1301_v55, %v460_v24 }
 0x118   : > { %v471_v34 = vmul.f32 %v1299_v49, %v467_v26  ;;  %v465_v36 = vmul.f32 %v1303_v59, %v461_v27 }
 0x119   : > { %v490_v38 = vmul.f32 %v1305_v32, %v470_v29  ;;  %v468_v39 = vadd.f32 0.2548296, %v464_v30 }
 0x11a   : > { %v491_v41 = vmul.f32 %v1307_v37, %v471_v34  ;;  %v469_v42 = vadd.f32 0.2548296, %v465_v36  ;;  %v1613_v12 = vpop.permute.xlu1 %645 }
 0x11b   : > { %v494_v43 = vsub.f32 1.0, %v490_v38  ;;  %v472_v44 = vmul.f32 %v1301_v55, %v468_v39  ;;  %v542_v38 = vlaneseq }
 0x11c   : > { %v495_v47 = vsub.f32 1.0, %v491_v41  ;;  %v473_v48 = vmul.f32 %v1303_v59, %v469_v42  ;;  %v1562_v59 = vpop.permute.xlu0 %522 }
 0x11d   : > { %v502_v51 = vsub.f32 0.0, %v494_v43  ;;  %v492_v52 = vmul.f32 %v1309_v45, %v472_v44  ;;  %v1641_v42 = vand.u32 127, %v542_v38 }
 0x11e   : > { %v503_v46 = vsub.f32 0.0, %v495_v47  ;;  %v493_v49 = vmul.f32 %v1311_v50, %v473_v48  ;;  %v1617_v14 = vpop.permute.xlu1 %691 }
 0x11f   : > { %v506_v53 = vsel %vm498_vm2, %v494_v43, %v502_v51  ;;  %v496_v54 = vsub.f32 1.0, %v492_v52  ;;  %v564_v43 = vshrl.u32 %v542_v38, 7  ;;  %vm544_vm6 = vcmp.lt.s32.totalorder %v1641_v42, 17  ;;  %v561_v52 = vld [vmem:[%s1996_s5] ss:$8 sm:$0x3] }
 0x120   : > { %v510_v58 = vadd.f32 1.0, %v506_v53  ;;  %v507_v55 = vsel %vm499_vm3, %v495_v47, %v503_v46  ;;  %v497_v60 = vsub.f32 1.0, %v493_v49  ;;  %v1615_v13 = vpop.permute.xlu0 %599  ;;  %vm635_vm7 = vcmp.lt.s32.totalorder %v1641_v42, 15 }
 0x121   : > { %v504_v61 = vsub.f32 0.0, %v496_v54  ;;  %v511_v63 = vadd.f32 1.0, %v507_v55  ;;  %v1648_v47 = vsub.s32 0, %v564_v43  ;;  %v1650_v48 = vsub.s32 1, %v564_v43 }
 0x122   : > { %v514_v62 = vmul.f32 %v510_v58, %v410_v57  ;;  %v505_v23 = vsub.f32 0.0, %v497_v60  ;;  %v1621_v16 = vpop.permute.xlu1 %733  ;;  %v1201_v55 = vld [vmem:[%s1996_s5 + $0x2] ss:$8 sm:$0x3]  ;;  %vm589_vm8 = vcmp.lt.s32.totalorder %v1641_v42, 16  ;;  %vm681_vm9 = vcmp.lt.s32.totalorder %v1641_v42, 1 }
 0x123   : > { %v508_v1 = vsel %vm500_vm4, %v496_v54, %v504_v61  ;;  %v1574_v5 = vmul.f32 %v511_v63, %v411_v0  ;;  %v1665_v53 = vrot.slane %v561_v52, %v1648_v47  ;;  %v1668_v54 = vrot.slane %v561_v52, %v1650_v48 }
 0x124   : > { %v512_v2 = vadd.f32 1.0, %v508_v1  ;;  %v509_v20 = vsel %vm501_vm5, %v497_v60, %v505_v23  ;;  %v1569_v3 = vmul.f32 %v1562_v59, %v514_v62  ;;  %581 = vrot.lane.b32.xlu1 %v514_v62, %s1403_s21  ;;  %534 = vrot.lane.b32.xlu0 %v514_v62, %s1404_s22  ;;  %v1619_v15 = vpop.permute.xlu0 %687  ;;  %v1691_v0 = vrot.slane %v1201_v55, %v1650_v48 }
 0x125   : > { %v513_v4 = vadd.f32 1.0, %v509_v20  ;;  %vm727_vm10 = vcmp.lt.s32.totalorder %v1641_v42, 127  ;;  %vm773_vm11 = vcmp.lt.s32.totalorder %v1641_v42, 113  ;;  %vm819_vm12 = vcmp.lt.s32.totalorder %v1641_v42, 112 }
 0x126   : > { %v516_v35 = vmul.f32 %v512_v2, %v412_v25  ;;  %v1625_v18 = vpop.permute.xlu1 %783  ;;  %vm865_vm13 = vcmp.lt.s32.totalorder %v1641_v42, 111  ;;  %vm1034_vm2 = vcmask 130048  }
 0x127   : > { %v517_v6 = vmul.f32 %v513_v4, %v413_v33 }
 0x128   : > { %v1576_v28 = vmul.f32 %v528_v22, %v516_v35  ;;  %627 = vrot.lane.b32.xlu1 %v514_v62, %s1405_s23  ;;  %538 = vrot.lane.b32.xlu0 %v1574_v5, %s1404_s22  ;;  %v1623_v17 = vpop.permute.xlu0 %737 }
 0x129   : > { %v1581_v7 = vmul.f32 %v528_v22, %v517_v6  ;;  %v1202_v22 = vld [vmem:[%s1996_s5 + $0x3] ss:$8 sm:$0x3] }
 0x12a   : > { %v1629_v21 = vpop.permute.xlu1 %825 }
 0x12c   : > { %673 = vrot.lane.b32.xlu1 %v514_v62, %s1406_s24  ;;  %631 = vrot.lane.b32.xlu0 %v1574_v5, %s1405_s23  ;;  %v1627_v19 = vpop.permute.xlu0 %779 }
 0x12e   : > { %v1633_v26 = vpop.permute.xlu1 %875 }
 0x130   : > { %719 = vrot.lane.b32.xlu1 %v514_v62, %s1407_s25  ;;  %723 = vrot.lane.b32.xlu0 %v1574_v5, %s1407_s25  ;;  %v1631_v24 = vpop.permute.xlu0 %829 }
 0x134   : > { %765 = vrot.lane.b32.xlu1 %v514_v62, %s1408_s26  ;;  %583 = vrot.lane.b32.xlu0 %v516_v35, %s1403_s21  ;;  %v1635_v27 = vpop.permute.xlu0 %871 }
 0x138   : > { %811 = vrot.lane.b32.xlu1 %v514_v62, %s1409_s10  ;;  %675 = vrot.lane.b32.xlu0 %v516_v35, %s1406_s24 }
 0x13c   : > { %857 = vrot.lane.b32.xlu1 %v514_v62, %s1410_s12  ;;  %767 = vrot.lane.b32.xlu0 %v516_v35, %s1408_s26  ;;  %v1200_v62 = vld [vmem:[%s1996_s5 + $0x1] ss:$8 sm:$0x3] }
 0x13d   : > { %v1696_v2 = vrot.slane %v1200_v62, %v1648_v47  ;;  %v1699_v20 = vrot.slane %v1200_v62, %v1650_v48 }
 0x140   : > { %585 = vrot.lane.b32.xlu1 %v1574_v5, %s1403_s21  ;;  %813 = vrot.lane.b32.xlu0 %v516_v35, %s1409_s10 }
 0x144   : > { %677 = vrot.lane.b32.xlu1 %v1574_v5, %s1406_s24  ;;  %859 = vrot.lane.b32.xlu0 %v516_v35, %s1410_s12 }
 0x148   : > { %769 = vrot.lane.b32.xlu1 %v1574_v5, %s1408_s26  ;;  %587 = vrot.lane.b32.xlu0 %v517_v6, %s1403_s21  ;;  %s1130_s21 = sshll.u32 %s298_s20, 4  ;;  %s1951_s21 = int_to_ptr.vmem [resolvable:$true] %s1130_s21 }
 0x14c   : > { %815 = vrot.lane.b32.xlu1 %v1574_v5, %s1409_s10  ;;  %679 = vrot.lane.b32.xlu0 %v517_v6, %s1406_s24 }
 0x150   : > { %536 = vrot.lane.b32.xlu1 %v516_v35, %s1404_s22  ;;  %771 = vrot.lane.b32.xlu0 %v517_v6, %s1408_s26  ;;  %s1329_s26 = scalar_lea.vmem %s1951_s21, 128 }
 0x151   : > { %p1330_p11 = scmp.ne.s32.totalorder %s1951_s21, %s1329_s26 }
 0x153   : > { %p1331_p12 = pnand %p1330_p11, %p1495_p5 }
 0x154   : > { %629 = vrot.lane.b32.xlu1 %v516_v35, %s1405_s23  ;;  %817 = vrot.lane.b32.xlu0 %v517_v6, %s1409_s10 }
 0x155   : > { %p1332_p13 = pneg %p1331_p12 }
 0x158   : > { %721 = vrot.lane.b32.xlu1 %v516_v35, %s1407_s25  ;;  %863 = vrot.lane.b32.xlu0 %v517_v6, %s1410_s12 }
 0x15c   : > { %540 = vrot.lane.b32.xlu1 %v517_v6, %s1404_s22  ;;  %912 = vperm.xlu0 %1294, %v904_v31  }
 0x160   : > { %633 = vrot.lane.b32.xlu1 %v517_v6, %s1405_s23  ;;  %s1949_s23 = scalar_lea.hbm %s1999_s8, %s1214_s19 }
 0x164   : > { %725 = vrot.lane.b32.xlu1 %v517_v6, %s1407_s25  ;;  %s1116_s25 = scalar_lea.sflag [#allocation3], %s296_s17 }
 0x168   : > { %861 = vrot.lane.b32.xlu1 %v1574_v5, %s1410_s12 }
 0x16c   : > { %907 = vperm.xlu1 %1293, %v903_v9  }
 0x170   : > { %1031 = vperm.xlu1 %1293, %v1028_v11   ;;  %v531_v11 = vmul.f32 %v1562_v59, %v1574_v5 }
 0x196   : > { %v582_v29 = vpop.permute.xlu1 %581  ;;  %v535_v30 = vpop.permute.xlu0 %534 }
 0x19a   : > { %v628_v32 = vpop.permute.xlu1 %627  ;;  %v539_v34 = vpop.permute.xlu0 %538 }
 0x19b   : > { %v545_v46 = vsel %vm544_vm6, %v535_v30, %v539_v34  ;;  %v547_v49 = vsel %vm544_vm6, %v539_v34, %v535_v30  ;;  %v1716_v34 = vrot.slane %v1202_v22, %v1648_v47 }
 0x19c   : > { %v557_v57 = vmul.f32 %v1555_v40, %v547_v49  ;;  %v558_v58 = vmul.f32 %v1555_v40, %v545_v46  ;;  %v1688_v40 = vrot.slane %v1201_v55, %v1648_v47 }
 0x19e   : > { %v674_v36 = vpop.permute.xlu1 %673  ;;  %v632_v37 = vpop.permute.xlu0 %631  ;;  %v573_v1 = vmul.f32 %v1665_v53, %v557_v57  ;;  %v574_v25 = vmul.f32 %v1668_v54, %v558_v58 }
 0x19f   : > { %v636_v63 = vsel %vm635_vm7, %v628_v32, %v632_v37  ;;  %v638_v23 = vsel %vm635_vm7, %v632_v37, %v628_v32 }
 0x1a0   : > { %v648_v35 = vmul.f32 %v642_v10, %v638_v23  ;;  %v649_v6 = vmul.f32 %v642_v10, %v636_v63  ;;  %v1719_v10 = vrot.slane %v1202_v22, %v1650_v48  ;;  %v577_v37 = vadd.f32 %v573_v1, %v1569_v3 }
 0x1a1   : > { %v578_v38 = vadd.f32 %v574_v25, %v531_v11 }
 0x1a2   : > { %v1637_v39 = vpop.permute.xlu1 %719  ;;  %v1639_v41 = vpop.permute.xlu0 %723  ;;  %v666_v52 = vmul.f32 %v1691_v0, %v649_v6 }
 0x1a6   : > { %v1643_v44 = vpop.permute.xlu1 %765  ;;  %v1645_v45 = vpop.permute.xlu0 %583 }
 0x1aa   : > { %v1652_v50 = vpop.permute.xlu1 %811  ;;  %v1654_v51 = vpop.permute.xlu0 %675 }
 0x1ae   : > { %v1675_v60 = vpop.permute.xlu1 %857  ;;  %v1677_v61 = vpop.permute.xlu0 %767 }
 0x1b2   : > { %v586_v33 = vpop.permute.xlu1 %585  ;;  %v1701_v4 = vpop.permute.xlu0 %813 }
 0x1b3   : > { %v590_v31 = vsel %vm589_vm8, %v582_v29, %v586_v33  ;;  %v592_v9 = vsel %vm589_vm8, %v586_v33, %v582_v29 }
 0x1b4   : > { %v602_v30 = vmul.f32 %v1604_v8, %v592_v9  ;;  %v603_v32 = vmul.f32 %v1604_v8, %v590_v31  ;;  %v665_v8 = vmul.f32 %v1688_v40, %v648_v35 }
 0x1b6   : > { %v619_v29 = vmul.f32 %v1696_v2, %v602_v30  ;;  %v620_v43 = vmul.f32 %v1699_v20, %v603_v32  ;;  %v678_v59 = vpop.permute.xlu1 %677  ;;  %v1724_v5 = vpop.permute.xlu0 %859  ;;  %v1204_v30 = vld [vmem:[%s1996_s5 + $0x6] ss:$8 sm:$0x3] }
 0x1b7   : > { %v682_v46 = vsel %vm681_vm9, %v674_v36, %v678_v59  ;;  %v684_v49 = vsel %vm681_vm9, %v678_v59, %v674_v36 }
 0x1b8   : > { %v623_v57 = vadd.f32 %v619_v29, %v577_v37  ;;  %v624_v3 = vadd.f32 %v620_v43, %v578_v38  ;;  %v694_v58 = vmul.f32 %v1619_v15, %v684_v49  ;;  %v695_v55 = vmul.f32 %v1619_v15, %v682_v46  ;;  %v1203_v15 = vld [vmem:[%s1996_s5 + $0x5] ss:$8 sm:$0x3]  ;;  %v1205_v43 = vld [vmem:[%s1996_s5 + $0x7] ss:$8 sm:$0x3] }
 0x1b9   : > { %v1758_v29 = vrot.slane %v1203_v15, %v1648_v47  ;;  %v1764_v59 = vrot.slane %v1203_v15, %v1650_v48  ;;  %v1777_v46 = vrot.slane %v1204_v30, %v1650_v48 }
 0x1ba   : > { %v669_v62 = vadd.f32 %v665_v8, %v623_v57  ;;  %v670_v63 = vadd.f32 %v666_v52, %v624_v3  ;;  %v711_v23 = vmul.f32 %v1716_v34, %v694_v58  ;;  %v712_v1 = vmul.f32 %v1719_v10, %v695_v55  ;;  %v1736_v25 = vpop.permute.xlu1 %769  ;;  %v588_v35 = vpop.permute.xlu0 %587  ;;  %v1206_v3 = vld [vmem:[%s1996_s5 + $0x10] ss:$8 sm:$0x3] }
 0x1bb   : > { %v591_v32 = vsel %vm589_vm8, %v1645_v45, %v588_v35  ;;  %v593_v37 = vsel %vm589_vm8, %v588_v35, %v1645_v45  ;;  %v1774_v52 = vrot.slane %v1204_v30, %v1648_v47  ;;  %v1786_v58 = vrot.slane %v1205_v43, %v1648_v47 }
 0x1bc   : > { %v1738_v33 = vadd.f32 %v711_v23, %v669_v62  ;;  %v1740_v22 = vadd.f32 %v712_v1, %v670_v63  ;;  %v604_v49 = vmul.f32 %v1615_v13, %v593_v37  ;;  %v605_v57 = vmul.f32 %v1615_v13, %v591_v32 }
 0x1bd   : > { %v1801_v15 = vrot.slane %v1206_v3, %v1648_v47  ;;  %v1804_v30 = vrot.slane %v1206_v3, %v1650_v48 }
 0x1be   : > { %v1742_v36 = vpop.permute.xlu1 %815  ;;  %v680_v6 = vpop.permute.xlu0 %679  ;;  %v621_v32 = vmul.f32 %v1696_v2, %v604_v49 }
 0x1bf   : > { %v683_v8 = vsel %vm681_vm9, %v1654_v51, %v680_v6  ;;  %v685_v45 = vsel %vm681_vm9, %v680_v6, %v1654_v51  ;;  %v1789_v51 = vrot.slane %v1205_v43, %v1650_v48 }
 0x1c0   : > { %v696_v63 = vmul.f32 %v1617_v14, %v685_v45  ;;  %v697_v13 = vmul.f32 %v1617_v14, %v683_v8  ;;  %v728_v14 = vsel %vm727_vm10, %v1637_v39, %v1639_v41 }
 0x1c2   : > { %v537_v31 = vpop.permute.xlu1 %536  ;;  %v772_v11 = vpop.permute.xlu0 %771  ;;  %v713_v45 = vmul.f32 %v1716_v34, %v696_v63 }
 0x1c3   : > { %v775_v47 = vsel %vm773_vm11, %v1677_v61, %v772_v11  ;;  %v777_v48 = vsel %vm773_vm11, %v772_v11, %v1677_v61 }
 0x1c4   : > { %v788_v11 = vmul.f32 %v1625_v18, %v775_v47  ;;  %v789_v34 = vmul.f32 %v1625_v18, %v777_v48  ;;  %v774_v47 = vsel %vm773_vm11, %v1643_v44, %v1736_v25 }
 0x1c6   : > { %v630_v9 = vpop.permute.xlu1 %629  ;;  %v818_v55 = vpop.permute.xlu0 %817 }
 0x1ca   : > { %v722_v38 = vpop.permute.xlu1 %721 }
 0x1ce   : > { %v541_v62 = vpop.permute.xlu1 %540 }
 0x1cf   : > { %v546_v23 = vsel %vm544_vm6, %v537_v31, %v541_v62  ;;  %v548_v1 = vsel %vm544_vm6, %v541_v62, %v537_v31  ;;  %v730_v31 = vsel %vm727_vm10, %v1639_v41, %v1637_v39  ;;  %v714_v39 = vmul.f32 %v1719_v10, %v697_v13 }
 0x1d0   : > { %v559_v35 = vmul.f32 %v1559_v56, %v548_v1  ;;  %v560_v6 = vmul.f32 %v1559_v56, %v546_v23  ;;  %v622_v56 = vmul.f32 %v1699_v20, %v605_v57  ;;  %v864_v20 = vpop.permute.xlu0 %863  ;;  %v821_v10 = vsel %vm819_vm12, %v1701_v4, %v818_v55 }
 0x1d1   : > { %v869_v18 = vsel %vm865_vm13, %v864_v20, %v1724_v5  ;;  %v740_v23 = vmul.f32 %v1621_v16, %v728_v14  ;;  %v741_v1 = vmul.f32 %v1621_v16, %v730_v31  ;;  %v776_v16 = vsel %vm773_vm11, %v1736_v25, %v1643_v44 }
 0x1d2   : > { %v575_v37 = vmul.f32 %v1665_v53, %v559_v35  ;;  %v576_v43 = vmul.f32 %v1668_v54, %v560_v6  ;;  %v634_v8 = vpop.permute.xlu1 %633  ;;  %v834_v35 = vmul.f32 %v1631_v24, %v821_v10  ;;  %v805_v14 = vmul.f32 %v1774_v52, %v788_v11 }
 0x1d3   : > { %v637_v41 = vsel %vm635_vm7, %v630_v9, %v634_v8  ;;  %v639_v2 = vsel %vm635_vm7, %v634_v8, %v630_v9  ;;  %v823_v9 = vsel %vm819_vm12, %v818_v55, %v1701_v4  ;;  %v806_v31 = vmul.f32 %v1777_v46, %v789_v34 }
 0x1d4   : > { %v579_v49 = vadd.f32 %v575_v37, %v1576_v28  ;;  %v580_v61 = vadd.f32 %v576_v43, %v1581_v7  ;;  %v650_v53 = vmul.f32 %v1613_v12, %v639_v2  ;;  %v651_v54 = vmul.f32 %v1613_v12, %v637_v41 }
 0x1d5   : > { %v867_v12 = vsel %vm865_vm13, %v1724_v5, %v864_v20  ;;  %v835_v5 = vmul.f32 %v1631_v24, %v823_v9  ;;  %v881_v24 = vmul.f32 %v1633_v26, %v869_v18  ;;  %v757_v43 = vmul.f32 %v1758_v29, %v740_v23 }
 0x1d6   : > { %v625_v57 = vadd.f32 %v621_v32, %v579_v49  ;;  %v626_v28 = vadd.f32 %v622_v56, %v580_v61  ;;  %v667_v7 = vmul.f32 %v1688_v40, %v650_v53  ;;  %v668_v3 = vmul.f32 %v1691_v0, %v651_v54  ;;  %v726_v62 = vpop.permute.xlu1 %725 }
 0x1d7   : > { %v729_v63 = vsel %vm727_vm10, %v722_v38, %v726_v62  ;;  %v731_v4 = vsel %vm727_vm10, %v726_v62, %v722_v38  ;;  %v758_v8 = vmul.f32 %v1764_v59, %v741_v1  ;;  %v851_v25 = vmul.f32 %v1786_v58, %v834_v35 }
 0x1d8   : > { %v671_v55 = vadd.f32 %v667_v7, %v625_v57  ;;  %v672_v13 = vadd.f32 %v668_v3, %v626_v28  ;;  %v742_v40 = vmul.f32 %v1623_v17, %v729_v63  ;;  %v743_v0 = vmul.f32 %v1623_v17, %v731_v4 }
 0x1d9   : > { %v880_v17 = vmul.f32 %v1633_v26, %v867_v12  ;;  %v822_v26 = vsel %vm819_vm12, %v1742_v36, %v1652_v50  ;;  %v898_v49 = vmul.f32 %v1804_v30, %v881_v24  ;;  %v762_v10 = vadd.f32 %v758_v8, %v1740_v22 }
 0x1da   : > { %v717_v6 = vadd.f32 %v713_v45, %v671_v55  ;;  %v718_v32 = vadd.f32 %v714_v39, %v672_v13  ;;  %v759_v56 = vmul.f32 %v1758_v29, %v742_v40  ;;  %v760_v38 = vmul.f32 %v1764_v59, %v743_v0  ;;  %v862_v44 = vpop.permute.xlu1 %861 }
 0x1db   : > { %v820_v45 = vsel %vm819_vm12, %v1652_v50, %v1742_v36  ;;  %v852_v39 = vmul.f32 %v1789_v51, %v835_v5  ;;  %v786_v29 = vmul.f32 %v1627_v19, %v774_v47  ;;  %v787_v59 = vmul.f32 %v1627_v19, %v776_v16  ;;  %v913_v34 = vpop.permute.xlu0 %912 }
 0x1dc   : > { %v763_v48 = vadd.f32 %v759_v56, %v717_v6  ;;  %v764_v37 = vadd.f32 %v760_v38, %v718_v32  ;;  %v897_v20 = vmul.f32 %v1801_v15, %v880_v17  ;;  %v866_v61 = vsel %vm865_vm13, %v1675_v60, %v862_v44 }
 0x1dd   : > { %v868_v50 = vsel %vm865_vm13, %v862_v44, %v1675_v60  ;;  %v832_v54 = vmul.f32 %v1629_v21, %v820_v45  ;;  %v833_v11 = vmul.f32 %v1629_v21, %v822_v26  ;;  %v761_v19 = vadd.f32 %v757_v43, %v1738_v33 }
 0x1de   : > { %v809_v41 = vadd.f32 %v805_v14, %v763_v48  ;;  %v810_v2 = vadd.f32 %v806_v31, %v764_v37  ;;  %v803_v28 = vmul.f32 %v1774_v52, %v786_v29  ;;  %v804_v7 = vmul.f32 %v1777_v46, %v787_v59 }
 0x1df   : > { %v878_v42 = vmul.f32 %v1635_v27, %v866_v61  ;;  %v879_v60 = vmul.f32 %v1635_v27, %v868_v50  ;;  %v849_v21 = vmul.f32 %v1786_v58, %v832_v54  ;;  %v850_v33 = vmul.f32 %v1789_v51, %v833_v11 }
 0x1e0   : > { %v855_v36 = vadd.f32 %v851_v25, %v809_v41  ;;  %v856_v53 = vadd.f32 %v852_v39, %v810_v2  ;;  %v807_v52 = vadd.f32 %v803_v28, %v761_v19  ;;  %v808_v46 = vadd.f32 %v804_v7, %v762_v10 }
 0x1e1   : > { %v895_v18 = vmul.f32 %v1801_v15, %v878_v42  ;;  %v896_v27 = vmul.f32 %v1804_v30, %v879_v60 }
 0x1e2   : > { %v901_v9 = vadd.f32 %v897_v20, %v855_v36  ;;  %v902_v57 = vadd.f32 %v898_v49, %v856_v53  ;;  %v853_v55 = vadd.f32 %v849_v21, %v807_v52  ;;  %v854_v58 = vadd.f32 %v850_v33, %v808_v46 }
 0x1e4   : > { %v1904_v3 = vadd.f32 %v913_v34, %v901_v9  ;;  %v1906_v62 = vadd.f32 %v913_v34, %v902_v57  ;;  %v899_v0 = vadd.f32 %v895_v18, %v853_v55  ;;  %v900_v23 = vadd.f32 %v896_v27, %v854_v58 }
 0x1e6   : > { %v1911_v22 = vmul.f32 0.70710677, %v1904_v3  ;;  %v1914_v12 = vmul.f32 0.70710677, %v1906_v62 }
 0x1e8   : > { %v929_v63 = vand.u32 2147483647, %v1911_v22  ;;  %v930_v4 = vand.u32 2147483647, %v1914_v12  ;;  %vm1009_vm14 = vcmp.ge.f32.partialorder %v1911_v22, 0.0  ;;  %vm1010_vm15 = vcmp.ge.f32.partialorder %v1914_v12, 0.0 }
 0x1ea   : > { %v933_v13 = vmul.f32 0.3275911, %v929_v63  ;;  %v934_v51 = vmul.f32 0.3275911, %v930_v4  ;;  %v985_v47 = vsub.f32 0.0, %v929_v63  ;;  %v986_v17 = vsub.f32 0.0, %v930_v4 }
 0x1eb   : > { %v908_v40 = vpop.permute.xlu1 %907 }
 0x1ec   : > { %v937_v1 = vadd.f32 1.0, %v933_v13  ;;  %v938_v35 = vadd.f32 1.0, %v934_v51  ;;  %v1920_v5 = vadd.f32 %v908_v40, %v899_v0  ;;  %v1922_v6 = vadd.f32 %v908_v40, %v900_v23 }
 0x1ed   : > { %v989_v48 = vmul.f32 %v985_v47, %v929_v63  ;;  %v990_v43 = vmul.f32 %v986_v17, %v930_v4 }
 0x1ee   : > { %1312 = vrcp.f32 %v937_v1  ;;  %v1925_v15 = vmul.f32 0.70710677, %v1920_v5  ;;  %v1928_v30 = vmul.f32 0.70710677, %v1922_v6  ;;  %v919_v22 = vmul.f32 0.5, %v1920_v5 }
 0x1ef   : > { %1314 = vrcp.f32 %v938_v35  ;;  %v995_v44 = vmul.f32 1.442695, %v989_v48  ;;  %v997_v39 = vmul.f32 1.442695, %v990_v43 }
 0x1f0   : > { %v927_v32 = vand.u32 2147483647, %v1925_v15  ;;  %v928_v56 = vand.u32 2147483647, %v1928_v30  ;;  %vm1007_vm0 = vcmp.ge.f32.partialorder %v1925_v15, 0.0  ;;  %vm1008_vm1 = vcmp.ge.f32.partialorder %v1928_v30, 0.0 }
 0x1f2   : > { %v931_v38 = vmul.f32 0.3275911, %v927_v32  ;;  %v932_v16 = vmul.f32 0.3275911, %v928_v56  ;;  %v983_v41 = vsub.f32 0.0, %v927_v32  ;;  %v984_v29 = vsub.f32 0.0, %v928_v56 }
 0x1f4   : > { %v935_v24 = vadd.f32 1.0, %v931_v38  ;;  %v936_v14 = vadd.f32 1.0, %v932_v16  ;;  %v987_v50 = vmul.f32 %v983_v41, %v927_v32  ;;  %v988_v54 = vmul.f32 %v984_v29, %v928_v56 }
 0x1f6   : > { %1316 = vrcp.f32 %v935_v24  ;;  %v991_v28 = vmul.f32 1.442695, %v987_v50  ;;  %v993_v60 = vmul.f32 1.442695, %v988_v54  ;;  %v922_v50 = vmul.f32 0.5, %v1906_v62  ;;  %v1032_v62 = vpop.permute.xlu1 %1031 }
 0x1f7   : > { %1318 = vrcp.f32 %v936_v14 }
 0x1f8   : > { %v1313_v31 = vpop.eup %1312  ;;  %1320 = vpow2.f32 %v995_v44 }
 0x1f9   : > { %v1315_v37 = vpop.eup %1314  ;;  %v949_v8 = vmul.f32 1.0614054, %v1313_v31  ;;  %1322 = vpow2.f32 %v997_v39 }
 0x1fa   : > { %v950_v45 = vmul.f32 1.0614054, %v1315_v37  ;;  %1324 = vpow2.f32 %v991_v28  ;;  %v1328_v28 = vld [vmem:[%s1522_s13] sm:$0xff]  ;;  %s1333_s13 = sshll.u32 %s1411_s9, 4  ;;  %s1334_s13 = int_to_ptr.vmem [resolvable:$false] %s1333_s13 }
 0x1fb   : > { %v953_v26 = vadd.f32 -1.4531521, %v949_v8  ;;  %1326 = vpow2.f32 %v993_v60  ;;  %s1335_s10 = scalar_lea.vmem %s1334_s13, 256  ;;  %p1336_p0 = scmp.lt.s32.totalorder %s1951_s21, %s1334_s13 }
 0x1fc   : > { %v954_v25 = vadd.f32 -1.4531521, %v950_v45  ;;  %p1337_p1 = scmp.lt.s32.totalorder %s1335_s10, %s1329_s26 }
 0x1fd   : > { %v957_v2 = vmul.f32 %v1313_v31, %v953_v26 }
 0x1fe   : > { %v958_v59 = vmul.f32 %v1315_v37, %v954_v25  ;;  %p1338_p2 = por %p1337_p1, %p1336_p0 }
 0x1ff   : > { %v961_v20 = vadd.f32 1.4214138, %v957_v2 }
 0x200   : > { %v962_v49 = vadd.f32 1.4214138, %v958_v59  ;;  %v1317_v61 = vpop.eup %1316  ;;  %p1339_p3 = pnand %p1338_p2, %p1332_p13 }
 0x201   : > { %v965_v36 = vmul.f32 %v1313_v31, %v961_v20  ;;  %v1319_v53 = vpop.eup %1318  ;;  %v947_v34 = vmul.f32 1.0614054, %v1317_v61 }
 0x202   : > { %v966_v11 = vmul.f32 %v1315_v37, %v962_v49  ;;  %v948_v19 = vmul.f32 1.0614054, %v1319_v53  ;;  %v1321_v55 = vpop.eup %1320  ;;  %v921_v49 = vmul.f32 0.5, %v1904_v3  ;;  %v1027_v3 = vld [vmem:[%s1997_s6] sm:$0xf] }
 0x203   : > { %v969_v10 = vadd.f32 -0.28449672, %v965_v36  ;;  %v951_v57 = vadd.f32 -1.4531521, %v947_v34  ;;  %v1323_v51 = vpop.eup %1322  ;;  %v920_v36 = vmul.f32 0.5, %v1922_v6 }
 0x204   : > { %v970_v9 = vadd.f32 -0.28449672, %v966_v11  ;;  %v952_v7 = vadd.f32 -1.4531521, %v948_v19  ;;  %v1325_v48 = vpop.eup %1324 }
 0x205   : > { %v973_v42 = vmul.f32 %v1313_v31, %v969_v10  ;;  %v955_v33 = vmul.f32 %v1317_v61, %v951_v57  ;;  %v1327_v8 = vpop.eup %1326 }
 0x206   : > { %v974_v21 = vmul.f32 %v1315_v37, %v970_v9  ;;  %v956_v52 = vmul.f32 %v1319_v53, %v952_v7 }
 0x207   : > { %v977_v46 = vadd.f32 0.2548296, %v973_v42  ;;  %v959_v27 = vadd.f32 1.4214138, %v955_v33 }
 0x208   : > { %v978_v18 = vadd.f32 0.2548296, %v974_v21  ;;  %v960_v63 = vadd.f32 1.4214138, %v956_v52 }
 0x209   : > { %v981_v4 = vmul.f32 %v1313_v31, %v977_v46  ;;  %v963_v13 = vmul.f32 %v1317_v61, %v959_v27 }
 0x20a   : > { %v982_v58 = vmul.f32 %v1315_v37, %v978_v18  ;;  %v964_v40 = vmul.f32 %v1319_v53, %v960_v63 }
 0x20b   : > { %v1001_v0 = vmul.f32 %v1321_v55, %v981_v4  ;;  %v967_v1 = vadd.f32 -0.28449672, %v963_v13 }
 0x20c   : > { %v1002_v23 = vmul.f32 %v1323_v51, %v982_v58  ;;  %v968_v35 = vadd.f32 -0.28449672, %v964_v40 }
 0x20d   : > { %v971_v32 = vmul.f32 %v1317_v61, %v967_v1  ;;  %v1005_v56 = vsub.f32 1.0, %v1001_v0 }
 0x20e   : > { %v972_v38 = vmul.f32 %v1319_v53, %v968_v35  ;;  %v1006_v47 = vsub.f32 1.0, %v1002_v23 }
 0x20f   : > { %v975_v16 = vadd.f32 0.2548296, %v971_v32  ;;  %v1013_v14 = vsub.f32 0.0, %v1005_v56 }
 0x210   : > { %v976_v17 = vadd.f32 0.2548296, %v972_v38  ;;  %v1014_v43 = vsub.f32 0.0, %v1006_v47 }
 0x211   : > { %v979_v24 = vmul.f32 %v1317_v61, %v975_v16  ;;  %v1017_v44 = vsel %vm1009_vm14, %v1005_v56, %v1013_v14 }
 0x212   : > { %v980_v31 = vmul.f32 %v1319_v53, %v976_v17  ;;  %v1018_v39 = vsel %vm1010_vm15, %v1006_v47, %v1014_v43  ;;  %v1021_v29 = vadd.f32 1.0, %v1017_v44 }
 0x213   : > { %v999_v37 = vmul.f32 %v1325_v48, %v979_v24  ;;  %v1022_v59 = vadd.f32 1.0, %v1018_v39 }
 0x214   : > { %v1000_v45 = vmul.f32 %v1327_v8, %v980_v31  ;;  %v1025_v15 = vmul.f32 %v1021_v29, %v921_v49 }
 0x215   : > { %v1003_v26 = vsub.f32 1.0, %v999_v37  ;;  %v1026_v34 = vmul.f32 %v1022_v59, %v922_v50 }
 0x216   : > { %v1004_v25 = vsub.f32 1.0, %v1000_v45 }
 0x217   : > { %v1011_v41 = vsub.f32 0.0, %v1003_v26 }
 0x218   : > { %v1012_v2 = vsub.f32 0.0, %v1004_v25 }
 0x219   : > { %v1015_v20 = vsel %vm1007_vm0, %v1003_v26, %v1011_v41 }
 0x21a   : > { %v1016_v61 = vsel %vm1008_vm1, %v1004_v25, %v1012_v2  ;;  %v1019_v12 = vadd.f32 1.0, %v1015_v20 }
 0x21b   : > { %v1020_v53 = vadd.f32 1.0, %v1016_v61 }
 0x21c   : > { %v1023_v54 = vmul.f32 %v1019_v12, %v919_v22 }
 0x21d   : > { %v1024_v11 = vmul.f32 %v1020_v53, %v920_v36 }
 0x21e   : > { %v1217_v30 = vpack.c.bf16 %v1025_v15, %v1023_v54 }
 0x21f   : > { %v1215_v19 = vpack.c.bf16 %v1026_v34, %v1024_v11 }
 0x221   : > { %1216 = vmatprep.subr.bf16.mxu1 %v1215_v19 }
 0x222   : > { %1218 = vmatpush1.bf16.msra.mxu1 %v1217_v30 }
 0x225   : > { %1207 = vmatmul.mubr.msk.f32.vlgmr.msra.gmra.mrb[0].mxu1 %vm1034_vm2, %v1027_v3 }
 0x2f8   : > { %v1104_v5 = vpop.f32.mrb[0].mxu1 }
 0x2f9   : > { %v1105_v6 = vadd.f32 %v1104_v5, %v1032_v62  ;;  %v1106_v10 = vpop.f32.mrb[1].mxu1 }
 0x2fa   : > { %v1107_v9 = vadd.f32 %v1106_v10, %v1032_v62 }
 0x2fc   : > { %v1111_v57 = vcombine.low %v1105_v6, %v1107_v9 }
 0x2fe   : > { %v1113_v7 = vadd.f32 %v1328_v28, %v1111_v57 }
 0x300   : > { %1114 = vst [vmem:[%s298_s20] sm:$0xff] %v1113_v7 }
 0x301   : > { %1342 = shalt.err (!%p1339_p3)
}
 0x302   : > { %s1343_s12 = scalar_lea.hbm %s1949_s23, 128  ;;  %s1347_s19 = scalar_lea.hbm %s1999_s8, 256 }
 0x303   : > { %p1344_p4 = scmp.ne.s32.totalorder %s1949_s23, %s1343_s12  ;;  %p1348_p9 = scmp.lt.u32.totalorder %s1949_s23, %s1999_s8 }
 0x304   : > { %p1349_p10 = scmp.lt.u32.totalorder %s1347_s19, %s1343_s12  ;;  %p1351_p12 = scmp.lt.u32.totalorder %s1343_s12, %s1949_s23 }
 0x305   : > { %p1345_p7 = pnand %p1344_p4, %p1495_p5 }
 0x306   : > { %p1350_p11 = por %p1349_p10, %p1348_p9 }
 0x307   : > { %p1346_p8 = pneg %p1345_p7 }
 0x308   : > { %p1352_p13 = por %p1351_p12, %p1350_p11 }
 0x30a   : > { %p1353_p0 = pnand %p1352_p13, %p1346_p8 }
 0x30c   : > { %1356 = shalt.err (!%p1353_p0)
}
 0x30d   : > { %1219 = dma.vmem_to_hbm [thread:$0]  (%p1495_p5), %s1951_s21, 128, %s1949_s23, %s1116_s25  }
 0x30e PF: > { %p1225_p1 = scmp.ge.s32.totalorder %s1391_s30, 2  ;;  %s1142_s22 = sand.u32 1, %s1379_s27  }
 0x30f   : > { %s1143_s26 = scalar_lea.sflag [#allocation3], %s1142_s22 }
 0x310   : > { %p1222_p2 = pnand %p1225_p1, %p1499_p6 }
 0x312   : > { %1374 = dma.done.wait (!%p1222_p2), %s1143_s26, 128  }
 0x313   : > { %1376 = vsyncadd (!%p1222_p2), %s1143_s26, 4294967168  ;;  %p18_p3 = scmp.ge.s32.totalorder %s1482_s11, 4   ;;  %s2002_s27 = smov %s1383_s28 }
 0x314   : > { %s2003_s28 = smov %s1387_s29  ;;  %s2004_s29 = smov %s1493_s14 }
 0x315   : > { %s2005_s30 = smov %s1482_s11  ;;  %20 = sbr.rel (!%p18_p3) target bundleno = 3 (0x3), region = 94 }
 0x31c   :  { %1148 = vsyncpa [#allocation3], 1 }
 0x31d   :  { %1150 = vsyncpa [#allocation3 + $0x1], 1 }

</bundles_post_ra>
